<compile_context>
chip_gen: v7x
topology: tpu7x:2x2x1
jax: 0.10.0
libtpu: 0.0.40
codegen_flags: <defaults>
</compile_context>

<pallas_src>
import functools
import math

import jax
import jax.numpy as jnp
from jax.experimental import pallas as pl
from jax.experimental.pallas import tpu as pltpu

EPS = 1e-5


# --------------------------------------------------------------------------- #
# Hardware-aware budgets
# --------------------------------------------------------------------------- #
def _hw_budgets():
    """(per-block tile budget bytes, vmem_limit_bytes), generation-aware."""
    try:
        info = pltpu.get_tpu_info()
        cap = int(getattr(info, "vmem_capacity_bytes", 64 * 1024 * 1024))
    except Exception:
        cap = 64 * 1024 * 1024
    if cap >= 100 * 1024 * 1024:                # v5e / v6e: 128 MiB VMEM
        return 8 * 1024 * 1024, 64 * 1024 * 1024
    return 4 * 1024 * 1024, 32 * 1024 * 1024    # v7x: 64 MiB VMEM per core


# --------------------------------------------------------------------------- #
# Kernels
# --------------------------------------------------------------------------- #
def _fused_bn_kernel(x_ref, w_ref, b_ref, o_ref, *, inv_count):
    """Whole-array BatchNorm: stats + normalize with x resident in VMEM.

    Channel stays on the sublane axis throughout; all reductions are along
    lanes / the leading batch axis, so no cross-sublane shuffles are needed.
    Uses exact two-pass variance (x is resident, second pass is free-ish).
    """
    x = x_ref[...].astype(jnp.float32)                                # (N,C,L)
    s = jnp.sum(jnp.sum(x, axis=2, keepdims=True), axis=0, keepdims=True)
    mean = s * inv_count                                              # (1,C,1)
    xc = x - mean
    v = jnp.sum(jnp.sum(xc * xc, axis=2, keepdims=True), axis=0, keepdims=True)
    var = v * inv_count                                               # (1,C,1)
    scale = w_ref[...].astype(jnp.float32) * jax.lax.rsqrt(var + EPS)
    o_ref[...] = (xc * scale + b_ref[...].astype(jnp.float32)).astype(o_ref.dtype)


def _stats_kernel(x_ref, sum_ref, sq_ref, *, tile_l, valid_l, needs_mask, num_l):
    """Per-row sum / sum-of-squares over the (row-tiles, lane-tiles) grid."""
    l = pl.program_id(1)

    @pl.when(l == 0)
    def _init():
        sum_ref[...] = jnp.zeros_like(sum_ref)
        sq_ref[...] = jnp.zeros_like(sq_ref)

    x = x_ref[...].astype(jnp.float32)                                # (TM,TL)

    def _accumulate(xv):
        sum_ref[...] += jnp.sum(xv, axis=-1, keepdims=True)
        sq_ref[...] += jnp.sum(xv * xv, axis=-1, keepdims=True)

    if needs_mask:
        # Mask work only runs on the (single) partial last lane tile.
        @pl.when(l == num_l - 1)
        def _last_tile():
            lane = jax.lax.broadcasted_iota(jnp.int32, x.shape, 1)
            _accumulate(jnp.where(l * tile_l + lane < valid_l, x, 0.0))

        @pl.when(l != num_l - 1)
        def _full_tile():
            _accumulate(x)
    else:
        _accumulate(x)


def _normalize_kernel(x_ref, scale_ref, shift_ref, o_ref):
    """out = x * scale + shift, one FMA per element (per-row scale/shift)."""
    x = x_ref[...].astype(jnp.float32)                                # (TM,TL)
    o_ref[...] = (x * scale_ref[...] + shift_ref[...]).astype(o_ref.dtype)


# --------------------------------------------------------------------------- #
# Tiling helpers
# --------------------------------------------------------------------------- #
def _sublane_pack(dtype):
    """Rows per packed 32-bit sublane group: 8 (f32), 16 (bf16), 32 (int8)."""
    return max(8, 32 // jnp.dtype(dtype).itemsize)


def _choose_fold(C, Lsp, pack):
    """Fold factor R: (C*R) multiple of the sublane pack, R divides Lsp."""
    target = pack // math.gcd(C, pack)
    divisors = [r for r in range(1, target + 1) if Lsp % r == 0]
    exact = [r for r in divisors if (C * r) % pack == 0]
    return max(exact) if exact else max(divisors)


def _choose_tiles(M, L, itemsize, pack, budget_bytes):
    """Row/lane tile for the flattened (M, L) view, ~budget bytes per block."""
    budget = max(budget_bytes // itemsize, pack * 128)      # elems per block
    rows_min = pack if M % pack == 0 else M
    if L * rows_min <= budget:
        tile_l = L                                          # full rows of lanes
    else:
        tile_l = max(128, min(L, budget // rows_min) // 128 * 128)
    if M % pack != 0:
        tile_m = M                                          # rare fallback
    else:
        tile_m = min(M, max(pack, (budget // tile_l) // pack * pack))
    return tile_m, tile_l


# --------------------------------------------------------------------------- #
# Forward
# --------------------------------------------------------------------------- #
def infer_dimension_forward(x, weight, bias, *, force_path=None,
                            tile_budget_bytes=None, donate=False):
    """Dimension-inferred BatchNorm{1,2,3}d forward (training-mode stats)."""
    ndim = x.ndim
    if ndim not in (3, 4, 5):
        raise ValueError(
            "InferDimension could not be inferred from shape. Only 5, 4 or 3 "
            f"dimensional input allowed (including batch dimension), got {ndim}."
        )
    N, C = x.shape[0], x.shape[1]
    spatial = x.shape[2:]
    Lsp = int(math.prod(spatial))
    itemsize = jnp.dtype(x.dtype).itemsize
    count = N * Lsp                       # reduction elements per channel
    total = N * C * Lsp

    budget, vmem_limit = _hw_budgets()
    if tile_budget_bytes is not None:
        budget = tile_budget_bytes

    # ------------------- fused single-kernel path (VMEM-resident) ---------- #
    fused_ok = total * 16 <= vmem_limit   # input + f32 temps + output headroom
    use_fused = (force_path == "fused") or (fused_ok and force_path is None)
    if use_fused:
        x3 = x.reshape(N, C, Lsp)                       # free reshape
        w3 = weight.astype(jnp.float32).reshape(1, C, 1)
        b3 = bias.astype(jnp.float32).reshape(1, C, 1)
        kernel = functools.partial(_fused_bn_kernel, inv_count=1.0 / count)
        out = pl.pallas_call(
            kernel,
            out_shape=jax.ShapeDtypeStruct((N, C, Lsp), x.dtype),
            grid_spec=pl.GridSpec(
                grid=(1,),
                in_specs=[
                    pl.BlockSpec((N, C, Lsp), lambda i: (0, 0, 0)),
                    pl.BlockSpec((1, C, 1), lambda i: (0, 0, 0)),
                    pl.BlockSpec((1, C, 1), lambda i: (0, 0, 0)),
                ],
                out_specs=pl.BlockSpec((N, C, Lsp), lambda i: (0, 0, 0)),
            ),
            compiler_params=pltpu.CompilerParams(
                dimension_semantics=("arbitrary",),
                vmem_limit_bytes=vmem_limit,
            ),
            cost_estimate=pl.CostEstimate(
                flops=int(7 * total), transcendentals=int(C),
                bytes_accessed=int(2 * total * itemsize),
            ),
        )(x3, w3, b3)
        return out.reshape(x.shape)

    # --------------------------- tiled two-pass path ----------------------- #
    # Free reshapes only: (N, C, S...) -> (N, C*R, Lsp/R) -> (N*C*R, Lsp/R).
    pack = _sublane_pack(x.dtype)
    R = _choose_fold(C, Lsp, pack)
    CR = C * R
    L = Lsp // R
    M = N * CR
    x2 = x.reshape(M, L)

    tile_m, tile_l = _choose_tiles(M, L, itemsize, pack, budget)
    num_m = pl.cdiv(M, tile_m)
    num_l = pl.cdiv(L, tile_l)
    needs_mask = (L % tile_l) != 0

    # Pass 1: per-row sum / sum-of-squares. Row axis parallel (megacore),
    # lane axis arbitrary with resident (tile_m, 1) accumulators.
    stats_kernel = functools.partial(
        _stats_kernel, tile_l=tile_l, valid_l=L, needs_mask=needs_mask,
        num_l=num_l)
    sums, sqs = pl.pallas_call(
        stats_kernel,
        out_shape=(jax.ShapeDtypeStruct((M, 1), jnp.float32),
                   jax.ShapeDtypeStruct((M, 1), jnp.float32)),
        grid_spec=pl.GridSpec(
            grid=(num_m, num_l),
            in_specs=[pl.BlockSpec((tile_m, tile_l), lambda m, l: (m, l))],
            out_specs=(pl.BlockSpec((tile_m, 1), lambda m, l: (m, 0)),
                       pl.BlockSpec((tile_m, 1), lambda m, l: (m, 0))),
        ),
        compiler_params=pltpu.CompilerParams(
            dimension_semantics=("parallel", "arbitrary"),
            vmem_limit_bytes=vmem_limit,
        ),
        cost_estimate=pl.CostEstimate(
            flops=int(3 * total), transcendentals=0,
            bytes_accessed=int(total * itemsize + 2 * M * 4),
        ),
    )(x2)

    # Tiny per-channel math (a few XLA ops on (C,)/(M,1)-sized data).
    # TODO(synk): var = E[x^2] - mean^2 (f32) can cancel when |mean| >> std;
    # switch to shifted sums if tighter parity with PyTorch is ever required.
    ch_sum = sums.reshape(N, C, R).sum(axis=(0, 2))
    ch_sq = sqs.reshape(N, C, R).sum(axis=(0, 2))
    mean = ch_sum / count
    var = jnp.maximum(ch_sq / count - mean * mean, 0.0)
    inv_std = jax.lax.rsqrt(var + EPS)
    scale_c = weight.astype(jnp.float32) * inv_std            # (C,)
    shift_c = bias.astype(jnp.float32) - mean * scale_c       # (C,)
    scale_m = jnp.broadcast_to(scale_c[None, :, None], (N, C, R)).reshape(M, 1)
    shift_m = jnp.broadcast_to(shift_c[None, :, None], (N, C, R)).reshape(M, 1)

    # Pass 2: normalize (single FMA per element), fully parallel grid.
    alias_kwargs = {"input_output_aliases": {0: 0}} if donate else {}
    out2 = pl.pallas_call(
        _normalize_kernel,
        out_shape=jax.ShapeDtypeStruct((M, L), x.dtype),
        grid_spec=pl.GridSpec(
            grid=(num_m, num_l),
            in_specs=[
                pl.BlockSpec((tile_m, tile_l), lambda m, l: (m, l)),
                pl.BlockSpec((tile_m, 1), lambda m, l: (m, 0)),
                pl.BlockSpec((tile_m, 1), lambda m, l: (m, 0)),
            ],
            out_specs=pl.BlockSpec((tile_m, tile_l), lambda m, l: (m, l)),
        ),
        compiler_params=pltpu.CompilerParams(
            dimension_semantics=("parallel", "parallel"),
            vmem_limit_bytes=vmem_limit,
        ),
        cost_estimate=pl.CostEstimate(
            flops=int(2 * total), transcendentals=0,
            bytes_accessed=int(2 * total * itemsize),
        ),
        **alias_kwargs,
    )(x2, scale_m, shift_m)

    return out2.reshape(x.shape)


# --------------------------------------------------------------------------- #
# Reference + demo
# --------------------------------------------------------------------------- #
def _reference(x, weight, bias):
    axes = (0,) + tuple(range(2, x.ndim))
    mean = jnp.mean(x, axis=axes, keepdims=True)
    var = jnp.mean((x - mean) ** 2, axis=axes, keepdims=True)
    shape = (1, x.shape[1]) + (1,) * (x.ndim - 2)
    return (x - mean) / jnp.sqrt(var + EPS) * weight.reshape(shape) + bias.reshape(shape)


if __name__ == "__main__":
    key = jax.random.PRNGKey(0)
    k1, k2, k3 = jax.random.split(key, 3)

    C = 4
    weight = jnp.ones((C,), jnp.float32) + 0.1 * jnp.arange(C, dtype=jnp.float32)
    bias = 0.05 * jnp.arange(C, dtype=jnp.float32)

    # BatchNorm2d path (4-D input) — small, takes the fused single-kernel path.
    x4 = jax.random.normal(k1, (2, C, 16, 16), dtype=jnp.float32)
    out4 = jax.block_until_ready(infer_dimension_forward(x4, weight, bias))
    assert out4.shape == x4.shape and out4.dtype == x4.dtype
    assert jnp.max(jnp.abs(out4 - _reference(x4, weight, bias))) < 2e-4

    # BatchNorm1d path (3-D input) — force the tiled two-pass path with a tiny
    # tile budget so the streaming kernels (multi-tile grid, masked partial
    # lane tile, megacore-parallel stats, resident accumulators) are exercised.
    x3 = jax.random.normal(k2, (2, C, 600), dtype=jnp.float32)
    out3 = jax.block_until_ready(
        infer_dimension_forward(x3, weight, bias, force_path="tiled",
                                tile_budget_bytes=1))
    assert out3.shape == x3.shape and out3.dtype == x3.dtype
    assert jnp.max(jnp.abs(out3 - _reference(x3, weight, bias))) < 2e-4

    # BatchNorm3d path (5-D input) — exercises the dimension inference.
    x5 = jax.random.normal(k3, (2, C, 4, 8, 8), dtype=jnp.float32)
    out5 = jax.block_until_ready(infer_dimension_forward(x5, weight, bias))
    assert out5.shape == x5.shape and out5.dtype == x5.dtype
    assert jnp.max(jnp.abs(out5 - _reference(x5, weight, bias))) < 2e-4

    print("KERNEL_OK")
</pallas_src>

<mosaic_0001>
module attributes {stable_mosaic.version = 11 : i64} {
  func.func @_fused_bn_kernel(%arg0: i32, %arg1: memref<2x4x256xf32, #tpu.memory_space<vmem>>, %arg2: memref<1x4x1xf32, #tpu.memory_space<vmem>>, %arg3: memref<1x4x1xf32, #tpu.memory_space<vmem>>, %arg4: memref<2x4x256xf32, #tpu.memory_space<vmem>>) attributes {dimension_semantics = [#tpu.dimension_semantics<arbitrary>], iteration_bounds = array<i64: 1>, scalar_prefetch = 0 : i64, scratch_operands = 0 : i64, tpu.core_type = #tpu.core_type<tc>, window_params = [{pipeline_mode = #tpu.pipeline_mode<synchronous>, transform_indices = @transform_0, window_bounds = array<i64: 2, 4, 256>}, {pipeline_mode = #tpu.pipeline_mode<synchronous>, transform_indices = @transform_1, window_bounds = array<i64: 1, 4, 1>}, {pipeline_mode = #tpu.pipeline_mode<synchronous>, transform_indices = @transform_2, window_bounds = array<i64: 1, 4, 1>}, {pipeline_mode = #tpu.pipeline_mode<synchronous>, transform_indices = @transform_3, window_bounds = array<i64: 2, 4, 256>}]} {
    %c0 = arith.constant 0 : index
    %c0_0 = arith.constant 0 : index
    %c0_1 = arith.constant 0 : index
    %0 = vector.load %arg1[%c0, %c0_0, %c0_1] : memref<2x4x256xf32, #tpu.memory_space<vmem>>, vector<2x4x256xf32>
    %cst = arith.constant dense<0.000000e+00> : vector<2x4xf32>
    %1 = vector.multi_reduction <add>, %0, %cst [2] : vector<2x4x256xf32> to vector<2x4xf32>
    %2 = vector.shape_cast %1 : vector<2x4xf32> to vector<2x4x1xf32>
    %cst_2 = arith.constant dense<0.000000e+00> : vector<4x1xf32>
    %3 = vector.multi_reduction <add>, %2, %cst_2 [0] : vector<2x4x1xf32> to vector<4x1xf32>
    %4 = vector.shape_cast %3 : vector<4x1xf32> to vector<1x4x1xf32>
    %cst_3 = arith.constant 0.001953125 : f32
    %5 = vector.broadcast %cst_3 : f32 to vector<1x4x1xf32>
    %6 = arith.mulf %4, %5 : vector<1x4x1xf32>
    %7 = vector.broadcast %6 : vector<1x4x1xf32> to vector<2x4x256xf32>
    %8 = arith.subf %0, %7 : vector<2x4x256xf32>
    %9 = arith.mulf %8, %8 : vector<2x4x256xf32>
    %cst_4 = arith.constant dense<0.000000e+00> : vector<2x4xf32>
    %10 = vector.multi_reduction <add>, %9, %cst_4 [2] : vector<2x4x256xf32> to vector<2x4xf32>
    %11 = vector.shape_cast %10 : vector<2x4xf32> to vector<2x4x1xf32>
    %cst_5 = arith.constant dense<0.000000e+00> : vector<4x1xf32>
    %12 = vector.multi_reduction <add>, %11, %cst_5 [0] : vector<2x4x1xf32> to vector<4x1xf32>
    %13 = vector.shape_cast %12 : vector<4x1xf32> to vector<1x4x1xf32>
    %cst_6 = arith.constant 0.001953125 : f32
    %14 = vector.broadcast %cst_6 : f32 to vector<1x4x1xf32>
    %15 = arith.mulf %13, %14 : vector<1x4x1xf32>
    %c0_7 = arith.constant 0 : index
    %c0_8 = arith.constant 0 : index
    %c0_9 = arith.constant 0 : index
    %16 = vector.load %arg2[%c0_7, %c0_8, %c0_9] : memref<1x4x1xf32, #tpu.memory_space<vmem>>, vector<1x4x1xf32>
    %cst_10 = arith.constant 9.99999974E-6 : f32
    %17 = vector.broadcast %cst_10 : f32 to vector<1x4x1xf32>
    %18 = arith.addf %15, %17 : vector<1x4x1xf32>
    %19 = math.rsqrt %18 : vector<1x4x1xf32>
    %20 = arith.mulf %16, %19 : vector<1x4x1xf32>
    %21 = vector.broadcast %20 : vector<1x4x1xf32> to vector<2x4x256xf32>
    %22 = arith.mulf %8, %21 : vector<2x4x256xf32>
    %c0_11 = arith.constant 0 : index
    %c0_12 = arith.constant 0 : index
    %c0_13 = arith.constant 0 : index
    %23 = vector.load %arg3[%c0_11, %c0_12, %c0_13] : memref<1x4x1xf32, #tpu.memory_space<vmem>>, vector<1x4x1xf32>
    %24 = vector.broadcast %23 : vector<1x4x1xf32> to vector<2x4x256xf32>
    %25 = arith.addf %22, %24 : vector<2x4x256xf32>
    %c0_14 = arith.constant 0 : index
    %c0_15 = arith.constant 0 : index
    %c0_16 = arith.constant 0 : index
    %26 = vector.load %arg4[%c0_14, %c0_15, %c0_16] : memref<2x4x256xf32, #tpu.memory_space<vmem>>, vector<2x4x256xf32>
    tpu.vector_store %arg4[%c0_14, %c0_15, %c0_16], %25 {strides = array<i32>} : memref<2x4x256xf32, #tpu.memory_space<vmem>>, vector<2x4x256xf32>,
    return
  }
  func.func @transform_0(%arg0: i32) -> (i32, i32, i32) {
    %c0_i32 = arith.constant 0 : i32
    %c0_i32_0 = arith.constant 0 : i32
    %c0_i32_1 = arith.constant 0 : i32
    %c0_i32_2 = arith.constant 0 : i32
    return %c0_i32, %c0_i32_0, %c0_i32_1 : i32, i32, i32
  }
  func.func @transform_1(%arg0: i32) -> (i32, i32, i32) {
    %c0_i32 = arith.constant 0 : i32
    %c0_i32_0 = arith.constant 0 : i32
    %c0_i32_1 = arith.constant 0 : i32
    %c0_i32_2 = arith.constant 0 : i32
    return %c0_i32, %c0_i32_0, %c0_i32_1 : i32, i32, i32
  }
  func.func @transform_2(%arg0: i32) -> (i32, i32, i32) {
    %c0_i32 = arith.constant 0 : i32
    %c0_i32_0 = arith.constant 0 : i32
    %c0_i32_1 = arith.constant 0 : i32
    %c0_i32_2 = arith.constant 0 : i32
    return %c0_i32, %c0_i32_0, %c0_i32_1 : i32, i32, i32
  }
  func.func @transform_3(%arg0: i32) -> (i32, i32, i32) {
    %c0_i32 = arith.constant 0 : i32
    %c0_i32_0 = arith.constant 0 : i32
    %c0_i32_1 = arith.constant 0 : i32
    %c0_i32_2 = arith.constant 0 : i32
    return %c0_i32, %c0_i32_0, %c0_i32_1 : i32, i32, i32
  }
}

</mosaic_0001>

<bundles_post_ra>
// kernel: tpu_custom_call.1
= control target key start
LH: loop header
LB: loop body
LE: loop exit
PB: predicated region body
PF: predicated region fallthrough
CT: control target
= control target key end

     0   :  { %8 = vsyncpa [#allocation3], 0  ;;  %s271_s0 = inlined_call_operand.hbm [shape: f32[2,4,256], index: 0, kind: input, shape index: {}]   ;;  %s272_s1 = inlined_call_operand.vmem [shape: f32[1,4,1], index: 1, kind: input, shape index: {}]   ;;  %s273_s2 = inlined_call_operand.vmem [shape: f32[1,4,1], index: 2, kind: input, shape index: {}]   ;;  %s274_s3 = inlined_call_operand.hbm [shape: f32[2,4,256], index: 3, kind: output, shape index: {}]  }
   0x1   :  { %9 = vsyncpa [#allocation4], 0  ;;  %s197_s12 = smov [#allocation2]   ;;  %s149_s16 = scalar_lea.hbm %s271_s0, 256 }
   0x2   :  { %s15_s13 = sshll.u32 %s197_s12, 4  ;;  %p150_p0 = scmp.ne.s32.totalorder %s271_s0, %s149_s16  ;;  %s16_s13 = int_to_ptr.vmem [resolvable:$true] %s15_s13 }
   0x3   :  { %p153_p1 = scmp.lt.u32.totalorder %s149_s16, %s271_s0 }
   0x5   :  { %p155_p2 = pnand %p153_p1, %p150_p0 }
   0x7   :  { %158 = shalt.err (!%p155_p2)
}
   0x8   :  { %s159_s21 = scalar_lea.vmem %s16_s13, 256  ;;  %p164_p4 = scmp.lt.s32.totalorder %s16_s13, %s16_s13 }
   0x9   :  { %p160_p3 = scmp.ne.s32.totalorder %s16_s13, %s159_s21  ;;  %p165_p5 = scmp.lt.s32.totalorder %s159_s21, %s159_s21 }
   0xb   :  { %p166_p6 = por %p165_p5, %p164_p4 }
   0xd   :  { %p167_p7 = pnand %p166_p6, %p160_p3 }
   0xf   :  { %170 = shalt.err (!%p167_p7)
}
  0x10   :  { %s198_s22 = smov 128   ;;  %s199_s23 = smov 8  }
  0x11   :  { %21 = dma.hbm_to_vmem [thread:$0]  %s271_s0, 256, %s16_s13, [#allocation3], %s198_s22, %s198_s22, %s199_s23  }
  0x12   :  { %193 = dma.done.wait [#allocation3], 256  }
  0x13   :  { %194 = vsyncadd [#allocation3], 4294967040  ;;  %vm37_vm0 = vcmask 1043456   ;;  %v29_v0 = vld [vmem:[#allocation2] sm:$0xff]  ;;  %v30_v1 = vld [vmem:[#allocation2 + $0x8] sm:$0xff]  ;;  %v56_v12 = vlaneseq  ;;  %v201_v35 = vmov 0  }
  0x14   :  { %v33_v2 = vcombine.high %v29_v0, %v29_v0  ;;  %v38_v3 = vsel %vm37_vm0, %v29_v0, 0.0  ;;  %v34_v4 = vcombine.high %v30_v1, %v30_v1  ;;  %v43_v6 = vsel %vm37_vm0, %v30_v1, 0.0  ;;  %143 = vset.pattern.permute.xlu0 %v201_v35  ;;  %144 = vset.pattern.permute.xlu1 %v201_v35  ;;  %v103_v36 = vld [vmem:[%s273_s2] sm:$0xf]  ;;  %s202_s2 = smov [#allocation5]  }
  0x15   :  { %v200_v10 = vmov 839922192   ;;  %v57_v15 = vshrl.u32 %v56_v12, 7  ;;  %v85_v44 = vld [vmem:[%s272_s1] sm:$0xf]  ;;  %s125_s29 = sshll.u32 %s202_s2, 4  ;;  %s126_s29 = int_to_ptr.vmem [resolvable:$true] %s125_s29 }
  0x16   :  { %v39_v5 = vsel %vm37_vm0, %v33_v2, 0.0  ;;  %v44_v7 = vsel %vm37_vm0, %v34_v4, 0.0  ;;  %v54_v11 = vunpack.c.l.s4 %v200_v10  ;;  %s171_s30 = scalar_lea.vmem %s126_s29, 256  ;;  %p176_p9 = scmp.lt.s32.totalorder %s126_s29, %s126_s29 }
  0x17   :  { %v40_v8 = vadd.f32 %v39_v5, %v38_v3  ;;  %v45_v9 = vadd.f32 %v44_v7, %v43_v6  ;;  %p172_p8 = scmp.ne.s32.totalorder %s126_s29, %s171_s30  ;;  %p177_p10 = scmp.lt.s32.totalorder %s171_s30, %s171_s30 }
  0x18   :  { %v55_v14 = vunpack.c.0.s8 %v54_v11 }
  0x19   :  { %41 = vadd.xlane.f32.xlu0 %v40_v8  ;;  %p178_p11 = por %p177_p10, %p176_p9 }
  0x1a   :  { %v58_v19 = vsub.s32 %v55_v14, %v57_v15 }
  0x1b   :  { %p179_p12 = pnand %p178_p11, %p172_p8 }
  0x1d   :  { %46 = vadd.xlane.f32.xlu0 %v45_v9 }
  0xa6   :  { %v42_v13 = vpop.xlane.xlu0 %41 }
  0xa7   :  { %v48_v17 = vsel %vm37_vm0, %v42_v13, 0.0 }
  0xaa   :  { %v47_v16 = vpop.xlane.xlu0 %46 }
  0xab   :  { %v49_v18 = vsel %vm37_vm0, %v47_v16, 0.0 }
  0xac   :  { %v50_v20 = vadd.f32 %v49_v18, %v48_v17 }
  0xae   :  { %v51_v21 = vmul.f32 0.001953125, %v50_v20 }
  0xb0   :  { %v59_v22 = vrot.slane %v51_v21, %v58_v19 }
  0xb2   :  { %v62_v23 = vsub.f32 %v30_v1, %v59_v22  ;;  %v61_v24 = vsub.f32 %v29_v0, %v59_v22 }
  0xb4   :  { %v63_v25 = vmul.f32 %v61_v24, %v61_v24  ;;  %v64_v26 = vmul.f32 %v62_v23, %v62_v23 }
  0xb6   :  { %v67_v27 = vcombine.high %v63_v25, %v63_v25  ;;  %v68_v28 = vcombine.high %v64_v26, %v64_v26  ;;  %v71_v29 = vsel %vm37_vm0, %v63_v25, 0.0  ;;  %v76_v33 = vsel %vm37_vm0, %v64_v26, 0.0 }
  0xb8   :  { %v72_v30 = vsel %vm37_vm0, %v67_v27, 0.0  ;;  %v77_v32 = vsel %vm37_vm0, %v68_v28, 0.0 }
  0xb9   :  { %v73_v31 = vadd.f32 %v72_v30, %v71_v29  ;;  %v78_v34 = vadd.f32 %v77_v32, %v76_v33 }
  0xbb   :  { %74 = vadd.xlane.f32.xlu1 %v73_v31 }
  0xbf   :  { %79 = vadd.xlane.f32.xlu1 %v78_v34 }
  0xd0   :  { %106 = vperm.xlu1 %144, %v103_v36  }
 0x148   :  { %v75_v37 = vpop.xlane.xlu1 %74 }
 0x149   :  { %v81_v39 = vsel %vm37_vm0, %v75_v37, 0.0 }
 0x14c   :  { %v80_v38 = vpop.xlane.xlu1 %79 }
 0x14d   :  { %v82_v40 = vsel %vm37_vm0, %v80_v38, 0.0 }
 0x14e   :  { %v83_v41 = vadd.f32 %v82_v40, %v81_v39 }
 0x150   :  { %v84_v42 = vmul.f32 0.001953125, %v83_v41  ;;  %v107_v47 = vpop.permute.xlu1 %106 }
 0x151   :  { %v114_v50 = vrot.slane %v107_v47, %v58_v19 }
 0x152   :  { %v86_v43 = vadd.f32 1e-05, %v84_v42 }
 0x154   :  { %147 = vrsqrt.f32 %v86_v43 }
 0x15e   :  { %v148_v45 = vpop.eup %147 }
 0x15f   :  { %v88_v46 = vmul.f32 %v148_v45, %v85_v44 }
 0x161   :  { %91 = vperm.xlu0 %143, %v88_v46  }
 0x1e0   :  { %v92_v48 = vpop.permute.xlu0 %91 }
 0x1e1   :  { %v99_v49 = vrot.slane %v92_v48, %v58_v19 }
 0x1e3   :  { %v101_v51 = vmul.f32 %v99_v49, %v61_v24  ;;  %v102_v52 = vmul.f32 %v99_v49, %v62_v23 }
 0x1e5   :  { %v116_v53 = vadd.f32 %v114_v50, %v101_v51  ;;  %v117_v54 = vadd.f32 %v114_v50, %v102_v52 }
 0x1e7   :  { %118 = vst [vmem:[#allocation5] sm:$0xff] %v116_v53  ;;  %119 = vst [vmem:[#allocation5 + $0x8] sm:$0xff] %v117_v54 }
 0x1e8   :  { %182 = shalt.err (!%p179_p12)
}
 0x1e9   :  { %s183_s5 = scalar_lea.hbm %s274_s3, 256 }
 0x1ea   :  { %p184_p13 = scmp.ne.s32.totalorder %s274_s3, %s183_s5  ;;  %p187_p0 = scmp.lt.u32.totalorder %s183_s5, %s274_s3 }
 0x1ec   :  { %p189_p1 = pnand %p187_p0, %p184_p13 }
 0x1ee   :  { %192 = shalt.err (!%p189_p1)
}
 0x1ef   :  { %131 = dma.vmem_to_hbm [thread:$0]  %s126_s29, 256, %s274_s3, [#allocation4], %s198_s22, %s198_s22, %s199_s23  }
 0x1f0   :  { %195 = dma.done.wait [#allocation4], 256  }
 0x1f1   :  { %196 = vsyncadd [#allocation4], 4294967040 }
 0x1f2   :  { %135 = vsyncpa [#allocation3], 1 }
 0x1f3   :  { %136 = vsyncpa [#allocation4], 1 }

</bundles_post_ra>
